<compile_context>
chip_gen: v7x
topology: tpu7x:2x2x1
jax: 0.10.0
libtpu: 0.0.40
codegen_flags: <defaults>
</compile_context>

<pallas_src>
import jax
import jax.numpy as jnp
from jax.experimental import pallas as pl
from jax.experimental.pallas import tpu as pltpu

HIDDEN = 100   # logical hidden width of the PyTorch module
H = 128        # hidden width zero-padded to a full lane/MXU tile


def circle_mlp_kernel(xT_ref, w1_ref, b1_ref, w2_ref, b2_ref, w3_ref, b3_ref,
                      o_ref):
    # xT_ref: (2, TN) f32      batch along lanes (lane-dense)
    # w1_ref: (H, 2) f32       b1_ref: (H, 1) f32
    # w2_ref: (H, H) bf16      b2_ref: (H, 1) f32
    # w3_ref: (H, 1) f32       b3_ref: (1, 1) f32
    # o_ref : (1, TN) f32
    x0 = xT_ref[0:1, :]                              # (1, TN)
    x1 = xT_ref[1:2, :]                              # (1, TN)

    # layer 1 (K=2): two broadcast FMAs on the VPU instead of a wasted MXU pass.
    h1 = w1_ref[:, 0:1] * x0 + w1_ref[:, 1:2] * x1 + b1_ref[...]   # (H, TN) f32
    h1 = jnp.maximum(h1, 0.0)

    # layer 2: (H,H) @ (H,TN) on the MXU, bf16 inputs, f32 accumulation.
    h2 = jnp.dot(w2_ref[...], h1.astype(jnp.bfloat16),
                 preferred_element_type=jnp.float32)                # (H, TN)
    h2 = jnp.maximum(h2 + b2_ref[...], 0.0)

    # layer 3 (out width 1): VPU multiply + sublane reduce keeps the MXU free
    # and the (1, TN) output lane-dense.
    h3 = jnp.sum(h2 * w3_ref[...], axis=0, keepdims=True) + b3_ref[...]
    o_ref[...] = h3.astype(o_ref.dtype)


def _round_up(a, m):
    return -(-a // m) * m


def prepare_params(params):
    """PyTorch-layout params -> padded kernel-layout params."""
    w1, b1, w2, b2, w3, b3 = params            # w: (out,in), b: (out,)
    w1p = jnp.zeros((H, 2), jnp.float32).at[:HIDDEN, :].set(w1)
    b1p = jnp.zeros((H, 1), jnp.float32).at[:HIDDEN, 0].set(b1)
    w2p = (jnp.zeros((H, H), jnp.float32)
           .at[:HIDDEN, :HIDDEN].set(w2)).astype(jnp.bfloat16)
    b2p = jnp.zeros((H, 1), jnp.float32).at[:HIDDEN, 0].set(b2)
    w3p = jnp.zeros((H, 1), jnp.float32).at[:HIDDEN, 0].set(w3[0])
    b3p = b3.reshape(1, 1).astype(jnp.float32)
    return w1p, b1p, w2p, b2p, w3p, b3p


def circle_model_forward(x, kernel_params, *, tile_n=1024):
    """x: (N, 2) f32 -> logits (N, 1) f32."""
    w1p, b1p, w2p, b2p, w3p, b3p = kernel_params
    N = x.shape[0]

    tn = min(_round_up(tile_n, 128), _round_up(N, 128))   # multiple of 128
    n_pad = _round_up(N, tn)                               # multiple of tn
    xT = jnp.zeros((2, n_pad), jnp.float32).at[:, :N].set(x.T)

    const = lambda shape: pl.BlockSpec(shape, lambda j: (0, 0))
    flops = 2 * n_pad * (2 * HIDDEN + HIDDEN * HIDDEN + HIDDEN)
    bytes_accessed = int(
        xT.size * 4 + n_pad * 4 +
        sum(int(p.size) * p.dtype.itemsize for p in kernel_params))

    out = pl.pallas_call(
        circle_mlp_kernel,
        out_shape=jax.ShapeDtypeStruct((1, n_pad), jnp.float32),
        grid_spec=pl.GridSpec(
            grid=(n_pad // tn,),
            in_specs=[
                pl.BlockSpec((2, tn), lambda j: (0, j)),   # x^T batch tile
                const((H, 2)), const((H, 1)),              # layer 1 (resident)
                const((H, H)), const((H, 1)),              # layer 2 (resident)
                const((H, 1)), const((1, 1)),              # layer 3 (resident)
            ],
            out_specs=pl.BlockSpec((1, tn), lambda j: (0, j)),
        ),
        compiler_params=pltpu.CompilerParams(
            dimension_semantics=("parallel",)),
        cost_estimate=pl.CostEstimate(
            flops=flops, transcendentals=0, bytes_accessed=bytes_accessed),
    )(xT, w1p, b1p, w2p, b2p, w3p, b3p)

    return out[0, :N].reshape(N, 1)


def init_params(key):
    """Deterministic init mimicking nn.Linear (weights in PyTorch (out,in) layout)."""
    def linear(k, fan_in, fan_out):
        kw, kb = jax.random.split(k)
        bound = 1.0 / jnp.sqrt(fan_in)
        w = jax.random.uniform(kw, (fan_out, fan_in), jnp.float32, -bound, bound)
        b = jax.random.uniform(kb, (fan_out,), jnp.float32, -bound, bound)
        return w, b

    k1, k2, k3 = jax.random.split(key, 3)
    w1, b1 = linear(k1, 2, HIDDEN)
    w2, b2 = linear(k2, HIDDEN, HIDDEN)
    w3, b3 = linear(k3, HIDDEN, 1)
    return w1, b1, w2, b2, w3, b3


def reference_forward(x, params):
    """Pure-f32 reference matching the PyTorch module."""
    w1, b1, w2, b2, w3, b3 = params
    hp = jax.lax.Precision.HIGHEST
    h = jnp.maximum(jnp.dot(x, w1.T, precision=hp) + b1, 0.0)
    h = jnp.maximum(jnp.dot(h, w2.T, precision=hp) + b2, 0.0)
    return jnp.dot(h, w3.T, precision=hp) + b3


def reference_forward_mixed(x, params):
    """Reference using the kernel's mixed precision (bf16 layer-2 matmul, f32 acc)."""
    w1, b1, w2, b2, w3, b3 = params
    hp = jax.lax.Precision.HIGHEST
    h = jnp.maximum(jnp.dot(x, w1.T, precision=hp) + b1, 0.0)
    h = jnp.dot(h.astype(jnp.bfloat16), w2.T.astype(jnp.bfloat16),
                preferred_element_type=jnp.float32)
    h = jnp.maximum(h + b2, 0.0)
    return jnp.dot(h, w3.T, precision=hp) + b3


if __name__ == "__main__":
    key = jax.random.PRNGKey(0)
    kx, kx2, kp = jax.random.split(key, 3)

    params = init_params(kp)
    kparams = prepare_params(params)

    # Small single-tile case.
    N = 8
    x = jax.random.normal(kx, (N, 2), jnp.float32)
    out = jax.block_until_ready(circle_model_forward(x, kparams))
    assert out.shape == (N, 1), out.shape
    assert jnp.allclose(out, reference_forward_mixed(x, params),
                        atol=2e-3, rtol=2e-3)
    assert jnp.allclose(out, reference_forward(x, params),
                        atol=2e-2, rtol=2e-2)

    # Multi-tile case (exercises batch tiling + padding path).
    N2 = 300
    x2 = jax.random.normal(kx2, (N2, 2), jnp.float32)
    out2 = jax.block_until_ready(circle_model_forward(x2, kparams, tile_n=128))
    assert out2.shape == (N2, 1), out2.shape
    assert jnp.allclose(out2, reference_forward_mixed(x2, params),
                        atol=2e-3, rtol=2e-3)
    assert jnp.allclose(out2, reference_forward(x2, params),
                        atol=2e-2, rtol=2e-2)

    print("KERNEL_OK")
</pallas_src>

<mosaic_0001>
module attributes {stable_mosaic.version = 11 : i64} {
  func.func @circle_mlp_kernel(%arg0: i32, %arg1: memref<2x128xf32, #tpu.memory_space<vmem>>, %arg2: memref<128x2xf32, #tpu.memory_space<vmem>>, %arg3: memref<128x1xf32, #tpu.memory_space<vmem>>, %arg4: memref<128x128xbf16, #tpu.memory_space<vmem>>, %arg5: memref<128x1xf32, #tpu.memory_space<vmem>>, %arg6: memref<128x1xf32, #tpu.memory_space<vmem>>, %arg7: memref<1x1xf32, #tpu.memory_space<vmem>>, %arg8: memref<1x128xf32, #tpu.memory_space<vmem>>) attributes {dimension_semantics = [#tpu.dimension_semantics<parallel>], iteration_bounds = array<i64: 1>, scalar_prefetch = 0 : i64, scratch_operands = 0 : i64, tpu.core_type = #tpu.core_type<tc>, window_params = [{transform_indices = @transform_0, window_bounds = array<i64: 2, 128>}, {pipeline_mode = #tpu.pipeline_mode<synchronous>, transform_indices = @transform_1, window_bounds = array<i64: 128, 2>}, {pipeline_mode = #tpu.pipeline_mode<synchronous>, transform_indices = @transform_2, window_bounds = array<i64: 128, 1>}, {pipeline_mode = #tpu.pipeline_mode<synchronous>, transform_indices = @transform_3, window_bounds = array<i64: 128, 128>}, {pipeline_mode = #tpu.pipeline_mode<synchronous>, transform_indices = @transform_4, window_bounds = array<i64: 128, 1>}, {pipeline_mode = #tpu.pipeline_mode<synchronous>, transform_indices = @transform_5, window_bounds = array<i64: 128, 1>}, {pipeline_mode = #tpu.pipeline_mode<synchronous>, transform_indices = @transform_6, window_bounds = array<i64: 1, 1>}, {transform_indices = @transform_7, window_bounds = array<i64: 1, 128>}]} {
    %c0 = arith.constant 0 : index
    %c0_0 = arith.constant 0 : index
    %0 = vector.load %arg1[%c0, %c0_0] : memref<2x128xf32, #tpu.memory_space<vmem>>, vector<1x128xf32>
    %c1 = arith.constant 1 : index
    %c0_1 = arith.constant 0 : index
    %1 = vector.load %arg1[%c1, %c0_1] : memref<2x128xf32, #tpu.memory_space<vmem>>, vector<1x128xf32>
    %c0_2 = arith.constant 0 : index
    %c0_3 = arith.constant 0 : index
    %2 = vector.load %arg2[%c0_2, %c0_3] : memref<128x2xf32, #tpu.memory_space<vmem>>, vector<128x1xf32>
    %3 = vector.broadcast %2 : vector<128x1xf32> to vector<128x128xf32>
    %4 = vector.broadcast %0 : vector<1x128xf32> to vector<128x128xf32>
    %5 = arith.mulf %3, %4 : vector<128x128xf32>
    %c0_4 = arith.constant 0 : index
    %c1_5 = arith.constant 1 : index
    %6 = vector.load %arg2[%c0_4, %c1_5] : memref<128x2xf32, #tpu.memory_space<vmem>>, vector<128x1xf32>
    %7 = vector.broadcast %6 : vector<128x1xf32> to vector<128x128xf32>
    %8 = vector.broadcast %1 : vector<1x128xf32> to vector<128x128xf32>
    %9 = arith.mulf %7, %8 : vector<128x128xf32>
    %10 = arith.addf %5, %9 : vector<128x128xf32>
    %c0_6 = arith.constant 0 : index
    %c0_7 = arith.constant 0 : index
    %11 = vector.load %arg3[%c0_6, %c0_7] : memref<128x1xf32, #tpu.memory_space<vmem>>, vector<128x1xf32>
    %12 = vector.broadcast %11 : vector<128x1xf32> to vector<128x128xf32>
    %13 = arith.addf %10, %12 : vector<128x128xf32>
    %cst = arith.constant 0.000000e+00 : f32
    %14 = vector.broadcast %cst : f32 to vector<128x128xf32>
    %15 = arith.maximumf %13, %14 : vector<128x128xf32>
    %c0_8 = arith.constant 0 : index
    %c0_9 = arith.constant 0 : index
    %16 = vector.load %arg4[%c0_8, %c0_9] : memref<128x128xbf16, #tpu.memory_space<vmem>>, vector<128x128xbf16>
    %17 = arith.truncf %15 : vector<128x128xf32> to vector<128x128xbf16>
    %cst_10 = arith.constant dense<0.000000e+00> : vector<128x128xf32>
    %18 = tpu.matmul %16, %17, %cst_10 {dimension_numbers = #tpu.dot_dimension_numbers<[1], [0], [0], [1], [0, 0, 1, 1], [], []>} : vector<128x128xbf16>, vector<128x128xbf16>, vector<128x128xf32> -> vector<128x128xf32>
    %c0_11 = arith.constant 0 : index
    %c0_12 = arith.constant 0 : index
    %19 = vector.load %arg5[%c0_11, %c0_12] : memref<128x1xf32, #tpu.memory_space<vmem>>, vector<128x1xf32>
    %20 = vector.broadcast %19 : vector<128x1xf32> to vector<128x128xf32>
    %21 = arith.addf %18, %20 : vector<128x128xf32>
    %cst_13 = arith.constant 0.000000e+00 : f32
    %22 = vector.broadcast %cst_13 : f32 to vector<128x128xf32>
    %23 = arith.maximumf %21, %22 : vector<128x128xf32>
    %c0_14 = arith.constant 0 : index
    %c0_15 = arith.constant 0 : index
    %24 = vector.load %arg6[%c0_14, %c0_15] : memref<128x1xf32, #tpu.memory_space<vmem>>, vector<128x1xf32>
    %25 = vector.broadcast %24 : vector<128x1xf32> to vector<128x128xf32>
    %26 = arith.mulf %23, %25 : vector<128x128xf32>
    %cst_16 = arith.constant dense<0.000000e+00> : vector<128xf32>
    %27 = vector.multi_reduction <add>, %26, %cst_16 [0] : vector<128x128xf32> to vector<128xf32>
    %28 = vector.shape_cast %27 : vector<128xf32> to vector<1x128xf32>
    %c0_17 = arith.constant 0 : index
    %c0_18 = arith.constant 0 : index
    %29 = vector.load %arg7[%c0_17, %c0_18] : memref<1x1xf32, #tpu.memory_space<vmem>>, vector<1x1xf32>
    %30 = vector.broadcast %29 : vector<1x1xf32> to vector<1x128xf32>
    %31 = arith.addf %28, %30 : vector<1x128xf32>
    %c0_19 = arith.constant 0 : index
    %c0_20 = arith.constant 0 : index
    %32 = vector.load %arg8[%c0_19, %c0_20] : memref<1x128xf32, #tpu.memory_space<vmem>>, vector<1x128xf32>
    tpu.vector_store %arg8[%c0_19, %c0_20], %31 {strides = array<i32>} : memref<1x128xf32, #tpu.memory_space<vmem>>, vector<1x128xf32>,
    return
  }
  func.func @transform_0(%arg0: i32) -> (i32, i32) {
    %c0_i32 = arith.constant 0 : i32
    %c0_i32_0 = arith.constant 0 : i32
    return %c0_i32, %arg0 : i32, i32
  }
  func.func @transform_1(%arg0: i32) -> (i32, i32) {
    %c0_i32 = arith.constant 0 : i32
    %c0_i32_0 = arith.constant 0 : i32
    %c0_i32_1 = arith.constant 0 : i32
    return %c0_i32, %c0_i32_0 : i32, i32
  }
  func.func @transform_2(%arg0: i32) -> (i32, i32) {
    %c0_i32 = arith.constant 0 : i32
    %c0_i32_0 = arith.constant 0 : i32
    %c0_i32_1 = arith.constant 0 : i32
    return %c0_i32, %c0_i32_0 : i32, i32
  }
  func.func @transform_3(%arg0: i32) -> (i32, i32) {
    %c0_i32 = arith.constant 0 : i32
    %c0_i32_0 = arith.constant 0 : i32
    %c0_i32_1 = arith.constant 0 : i32
    return %c0_i32, %c0_i32_0 : i32, i32
  }
  func.func @transform_4(%arg0: i32) -> (i32, i32) {
    %c0_i32 = arith.constant 0 : i32
    %c0_i32_0 = arith.constant 0 : i32
    %c0_i32_1 = arith.constant 0 : i32
    return %c0_i32, %c0_i32_0 : i32, i32
  }
  func.func @transform_5(%arg0: i32) -> (i32, i32) {
    %c0_i32 = arith.constant 0 : i32
    %c0_i32_0 = arith.constant 0 : i32
    %c0_i32_1 = arith.constant 0 : i32
    return %c0_i32, %c0_i32_0 : i32, i32
  }
  func.func @transform_6(%arg0: i32) -> (i32, i32) {
    %c0_i32 = arith.constant 0 : i32
    %c0_i32_0 = arith.constant 0 : i32
    %c0_i32_1 = arith.constant 0 : i32
    return %c0_i32, %c0_i32_0 : i32, i32
  }
  func.func @transform_7(%arg0: i32) -> (i32, i32) {
    %c0_i32 = arith.constant 0 : i32
    %c0_i32_0 = arith.constant 0 : i32
    return %c0_i32, %arg0 : i32, i32
  }
}

</mosaic_0001>

<bundles_post_ra>
// kernel: tpu_custom_call.1
= control target key start
LH: loop header
LB: loop body
LE: loop exit
PB: predicated region body
PF: predicated region fallthrough
CT: control target
= control target key end

     0   :  { %s1306_s0 = inlined_call_operand.vmem [shape: f32[2,128], index: 0, kind: input, shape index: {}]   ;;  %s1307_s1 = inlined_call_operand.vmem [shape: f32[128,2], index: 1, kind: input, shape index: {}]   ;;  %s1308_s2 = inlined_call_operand.vmem [shape: f32[128,1], index: 2, kind: input, shape index: {}]   ;;  %s1309_s3 = inlined_call_operand.vmem [shape: bf16[128,128], index: 3, kind: input, shape index: {}]   ;;  %s1310_s4 = inlined_call_operand.vmem [shape: f32[128,1], index: 4, kind: input, shape index: {}]   ;;  %s1311_s5 = inlined_call_operand.vmem [shape: f32[128,1], index: 5, kind: input, shape index: {}]   ;;  %s1312_s6 = inlined_call_operand.<no memory space> [shape: f32[1,1], index: 6, kind: input, shape index: {}]   ;;  %s1313_s7 = inlined_call_operand.hbm [shape: f32[1,128], index: 7, kind: output, shape index: {}]  }
   0x1   :  { %v12_v0 = vstv %s1312_s6 }
   0x2   :  { %13 = vst [vmem:[#allocation2] sm:$0x1] %v12_v0 }
   0x3   :  { %v34_v1 = vld [vmem:[%s1307_s1 + $0x10] sm:$0xff]  ;;  %v32_v2 = vld [vmem:[%s1307_s1] sm:$0xff]  ;;  %v943_v3 = vmov 1   ;;  %v33_v5 = vld [vmem:[%s1307_s1 + $0x8] sm:$0xff]  ;;  %v944_v8 = vmov 0  }
   0x4   :  { %895 = vset.pattern.permute.xlu0 %v943_v3  ;;  %893 = vset.pattern.permute.xlu1 %v943_v3  ;;  %v36_v4 = vld [vmem:[%s1307_s1 + $0x20] sm:$0xff]  ;;  %v38_v6 = vld [vmem:[%s1307_s1 + $0x30] sm:$0xff]  ;;  %v35_v7 = vld [vmem:[%s1307_s1 + $0x18] sm:$0xff] }
   0x5   :  { %157 = vperm.xlu0 %895, %v34_v1   ;;  %149 = vperm.xlu1 %893, %v32_v2   ;;  %v40_v9 = vld [vmem:[%s1307_s1 + $0x40] sm:$0xff]  ;;  %v42_v10 = vld [vmem:[%s1307_s1 + $0x50] sm:$0xff] }
   0x6   :  { %v248_v11 = vld [vmem:[%s1308_s2] sm:$0xff]  ;;  %v1030_v13 = vld [vmem:[%s1307_s1 + $0x70] sm:$0xff] }
   0x7   :  { %v1023_v12 = vld [vmem:[%s1307_s1 + $0x60] sm:$0xff] }
   0x9   :  { %165 = vperm.xlu0 %895, %v36_v4   ;;  %153 = vperm.xlu1 %893, %v33_v5  }
   0xd   :  { %173 = vperm.xlu0 %895, %v38_v6   ;;  %894 = vset.pattern.permute.xlu1 %v944_v8 }
   0xe   :  { %65 = vperm.xlu1 %894, %v35_v7  }
  0x11   :  { %181 = vperm.xlu0 %895, %v40_v9  }
  0x12   :  { %896 = vset.pattern.permute.xlu1 %v943_v3 }
  0x13   :  { %161 = vperm.xlu1 %896, %v35_v7  }
  0x15   :  { %189 = vperm.xlu0 %895, %v42_v10  }
  0x17   :  { %897 = vset.pattern.permute.xlu1 %v944_v8 }
  0x18   :  { %266 = vperm.xlu1 %897, %v248_v11  }
  0x19   :  { %197 = vperm.xlu0 %895, %v1023_v12  }
  0x1a   :  { %14 = vsyncpa [#allocation4], 0  ;;  %v37_v14 = vld [vmem:[%s1307_s1 + $0x28] sm:$0xff]  ;;  %v250_v15 = vld [vmem:[%s1308_s2 + $0x10] sm:$0xff] }
  0x1b   :  { %v249_v16 = vld [vmem:[%s1308_s2 + $0x8] sm:$0xff]  ;;  %v251_v17 = vld [vmem:[%s1308_s2 + $0x18] sm:$0xff]  ;;  %v252_v21 = vld [vmem:[%s1308_s2 + $0x20] sm:$0xff] }
  0x1c   :  { %70 = vperm.xlu1 %897, %v36_v4   ;;  %v39_v18 = vld [vmem:[%s1307_s1 + $0x38] sm:$0xff]  ;;  %v253_v19 = vld [vmem:[%s1308_s2 + $0x28] sm:$0xff]  ;;  %v400_v26 = vld [vmem:[%s1310_s4] sm:$0xff] }
  0x1d   :  { %205 = vperm.xlu0 %895, %v1030_v13   ;;  %v255_v20 = vld [vmem:[%s1308_s2 + $0x38] sm:$0xff]  ;;  %v257_v22 = vld [vmem:[%s1308_s2 + $0x48] sm:$0xff]  ;;  %v402_v27 = vld [vmem:[%s1310_s4 + $0x10] sm:$0xff] }
  0x1e   :  { %v259_v23 = vld [vmem:[%s1308_s2 + $0x58] sm:$0xff]  ;;  %v41_v24 = vld [vmem:[%s1307_s1 + $0x48] sm:$0xff]  ;;  %v254_v28 = vld [vmem:[%s1308_s2 + $0x30] sm:$0xff] }
  0x1f   :  { %v261_v25 = vld [vmem:[%s1308_s2 + $0x68] sm:$0xff]  ;;  %v404_v29 = vld [vmem:[%s1310_s4 + $0x20] sm:$0xff]  ;;  %v43_v31 = vld [vmem:[%s1307_s1 + $0x58] sm:$0xff] }
  0x20   :  { %75 = vperm.xlu1 %897, %v37_v14   ;;  %v658_v30 = vld [vmem:[%s1311_s5 + $0x8] sm:$0xff]  ;;  %v406_v33 = vld [vmem:[%s1310_s4 + $0x30] sm:$0xff]  ;;  %v256_v34 = vld [vmem:[%s1308_s2 + $0x40] sm:$0xff] }
  0x21   :  { %908 = vset.pattern.permute.xlu0 %v944_v8  ;;  %v405_v32 = vld [vmem:[%s1310_s4 + $0x28] sm:$0xff]  ;;  %v407_v35 = vld [vmem:[%s1310_s4 + $0x38] sm:$0xff]  ;;  %v408_v36 = vld [vmem:[%s1310_s4 + $0x40] sm:$0xff] }
  0x22   :  { %50 = vperm.xlu0 %908, %v32_v2   ;;  %v45_v37 = vld [vmem:[%s1307_s1 + $0x68] sm:$0xff]  ;;  %v410_v39 = vld [vmem:[%s1310_s4 + $0x50] sm:$0xff]  ;;  %v411_v40 = vld [vmem:[%s1310_s4 + $0x58] sm:$0xff] }
  0x23   :  { %v409_v38 = vld [vmem:[%s1310_s4 + $0x48] sm:$0xff]  ;;  %v258_v41 = vld [vmem:[%s1308_s2 + $0x50] sm:$0xff]  ;;  %v412_v42 = vld [vmem:[%s1310_s4 + $0x60] sm:$0xff] }
  0x24   :  { %898 = vset.pattern.permute.xlu1 %v943_v3  ;;  %v413_v43 = vld [vmem:[%s1310_s4 + $0x68] sm:$0xff]  ;;  %v47_v44 = vld [vmem:[%s1307_s1 + $0x78] sm:$0xff]  ;;  %v414_v45 = vld [vmem:[%s1310_s4 + $0x70] sm:$0xff] }
  0x25   :  { %169 = vperm.xlu1 %898, %v37_v14   ;;  %v415_v46 = vld [vmem:[%s1310_s4 + $0x78] sm:$0xff]  ;;  %v260_v47 = vld [vmem:[%s1308_s2 + $0x60] sm:$0xff]  ;;  %v671_v48 = vld [vmem:[%s1311_s5 + $0x70] sm:$0xff] }
  0x26   :  { %55 = vperm.xlu0 %908, %v33_v5   ;;  %v262_v51 = vld [vmem:[%s1308_s2 + $0x70] sm:$0xff]  ;;  %v790_v52 = vld [vmem:[#allocation2] sm:$0x1]  ;;  %v263_v55 = vld [vmem:[%s1308_s2 + $0x78] sm:$0xff] }
  0x27   :  { %v401_v58 = vld [vmem:[%s1310_s4 + $0x8] sm:$0xff]  ;;  %v403_v60 = vld [vmem:[%s1310_s4 + $0x18] sm:$0xff]  ;;  %v911_v62 = vld [vmem:[%s1309_s3] sm:$0xff]  }
  0x28   :  { %v912_v63 = vld [vmem:[%s1309_s3 + $0x20] sm:$0xff]   ;;  %858 = vmatprep.mubr.bf16.mxu0 %v911_v62  ;;  %v659_v4 = vld [vmem:[%s1311_s5 + $0x10] sm:$0xff]  ;;  %v660_v7 = vld [vmem:[%s1311_s5 + $0x18] sm:$0xff] }
  0x29   :  { %899 = vset.pattern.permute.xlu1 %v944_v8  ;;  %866 = vmatprep.mubr.bf16.mxu1 %v912_v63  ;;  %v1198_v11 = vld [vmem:[%s1306_s0 + $0x1] ss:$0 sm:$0xff]  ;;  %v668_v62 = vld [vmem:[%s1311_s5 + $0x58] sm:$0xff] }
  0x2a   :  { %60 = vperm.xlu0 %908, %v34_v1   ;;  %276 = vperm.xlu1 %899, %v250_v15   ;;  %v657_v1 = vld [vmem:[%s1311_s5] sm:$0xff] }
  0x2e   :  { %271 = vperm.xlu0 %908, %v249_v16   ;;  %80 = vperm.xlu1 %899, %v38_v6   ;;  %v662_v16 = vld [vmem:[%s1311_s5 + $0x28] sm:$0xff] }
  0x32   :  { %281 = vperm.xlu0 %908, %v251_v17   ;;  %85 = vperm.xlu1 %899, %v39_v18  }
  0x36   :  { %291 = vperm.xlu0 %908, %v253_v19   ;;  %900 = vset.pattern.permute.xlu1 %v943_v3 }
  0x37   :  { %177 = vperm.xlu1 %900, %v39_v18  }
  0x3a   :  { %301 = vperm.xlu0 %908, %v255_v20  }
  0x3b   :  { %901 = vset.pattern.permute.xlu1 %v944_v8 }
  0x3c   :  { %286 = vperm.xlu1 %901, %v252_v21  }
  0x3e   :  { %311 = vperm.xlu0 %908, %v257_v22  }
  0x40   :  { %90 = vperm.xlu1 %901, %v40_v9  }
  0x42   :  { %321 = vperm.xlu0 %908, %v259_v23   ;;  %v663_v23 = vld [vmem:[%s1311_s5 + $0x30] sm:$0xff] }
  0x44   :  { %95 = vperm.xlu1 %901, %v41_v24  }
  0x46   :  { %331 = vperm.xlu0 %908, %v261_v25  }
  0x48   :  { %902 = vset.pattern.permute.xlu1 %v943_v3 }
  0x49   :  { %185 = vperm.xlu1 %902, %v41_v24  }
  0x4a   :  { %418 = vperm.xlu0 %908, %v400_v26  }
  0x4d   :  { %903 = vset.pattern.permute.xlu1 %v944_v8 }
  0x4e   :  { %428 = vperm.xlu0 %908, %v402_v27   ;;  %296 = vperm.xlu1 %903, %v254_v28  }
  0x52   :  { %438 = vperm.xlu0 %908, %v404_v29   ;;  %100 = vperm.xlu1 %903, %v42_v10   ;;  %v661_v10 = vld [vmem:[%s1311_s5 + $0x20] sm:$0xff] }
  0x56   :  { %680 = vperm.xlu0 %908, %v658_v30   ;;  %105 = vperm.xlu1 %903, %v43_v31  }
  0x5a   :  { %443 = vperm.xlu0 %908, %v405_v32   ;;  %904 = vset.pattern.permute.xlu1 %v943_v3  ;;  %v664_v32 = vld [vmem:[%s1311_s5 + $0x38] sm:$0xff] }
  0x5b   :  { %193 = vperm.xlu1 %904, %v43_v31  }
  0x5e   :  { %448 = vperm.xlu0 %908, %v406_v33  }
  0x5f   :  { %905 = vset.pattern.permute.xlu1 %v944_v8 }
  0x60   :  { %306 = vperm.xlu1 %905, %v256_v34  }
  0x62   :  { %453 = vperm.xlu0 %908, %v407_v35  }
  0x64   :  { %110 = vperm.xlu1 %905, %v1023_v12   ;;  %v1203_v12 = vld [vmem:[%s1306_s0] ss:$0 sm:$0xff] }
  0x66   :  { %458 = vperm.xlu0 %908, %v408_v36  }
  0x68   :  { %115 = vperm.xlu1 %905, %v45_v37  }
  0x6a   :  { %463 = vperm.xlu0 %908, %v409_v38  }
  0x6c   :  { %906 = vset.pattern.permute.xlu1 %v943_v3 }
  0x6d   :  { %201 = vperm.xlu1 %906, %v45_v37  }
  0x6e   :  { %468 = vperm.xlu0 %908, %v410_v39  }
  0x71   :  { %907 = vset.pattern.permute.xlu1 %v944_v8 }
  0x72   :  { %473 = vperm.xlu0 %908, %v411_v40   ;;  %316 = vperm.xlu1 %907, %v258_v41   ;;  %v665_v41 = vld [vmem:[%s1311_s5 + $0x40] sm:$0xff] }
  0x76   :  { %478 = vperm.xlu0 %908, %v412_v42   ;;  %120 = vperm.xlu1 %907, %v1030_v13  }
  0x7a   :  { %483 = vperm.xlu0 %908, %v413_v43   ;;  %125 = vperm.xlu1 %907, %v47_v44  }
  0x7e   :  { %488 = vperm.xlu0 %908, %v414_v45   ;;  %909 = vset.pattern.permute.xlu1 %v943_v3 }
  0x7f   :  { %209 = vperm.xlu1 %909, %v47_v44  }
  0x82   :  { %493 = vperm.xlu0 %908, %v415_v46  }
  0x83   :  { %910 = vset.pattern.permute.xlu1 %v944_v8 }
  0x84   :  { %326 = vperm.xlu1 %910, %v260_v47   ;;  %v150_v49 = vpop.permute.xlu1 %149  ;;  %v158_v50 = vpop.permute.xlu0 %157  ;;  %v666_v47 = vld [vmem:[%s1311_s5 + $0x48] sm:$0xff] }
  0x85   :  { %v216_v17 = vmul.f32 %v1198_v11, %v150_v49  ;;  %v218_v18 = vmul.f32 %v1198_v11, %v158_v50 }
  0x86   :  { %745 = vperm.xlu0 %908, %v671_v48  }
  0x88   :  { %336 = vperm.xlu1 %910, %v262_v51   ;;  %v154_v53 = vpop.permute.xlu1 %153  ;;  %v1156_v54 = vpop.permute.xlu0 %165 }
  0x89   :  { %v217_v24 = vmul.f32 %v1198_v11, %v154_v53  ;;  %v220_v48 = vmul.f32 %v1198_v11, %v1156_v54 }
  0x8a   :  { %793 = vperm.xlu0 %908, %v790_v52  }
  0x8c   :  { %341 = vperm.xlu1 %910, %v263_v55   ;;  %v1161_v56 = vpop.permute.xlu0 %173 }
  0x8d   :  { %v66_v57 = vpop.permute.xlu1 %65 }
  0x8e   :  { %v135_v33 = vmul.f32 %v1203_v12, %v66_v57  ;;  %v667_v57 = vld [vmem:[%s1311_s5 + $0x50] sm:$0xff] }
  0x90   :  { %423 = vperm.xlu1 %910, %v401_v58   ;;  %v1166_v59 = vpop.permute.xlu0 %181 }
  0x92   :  { %v162_v61 = vpop.permute.xlu1 %161 }
  0x93   :  { %v219_v26 = vmul.f32 %v1198_v11, %v162_v61 }
  0x94   :  { %433 = vperm.xlu1 %910, %v403_v60   ;;  %v1177_v0 = vpop.permute.xlu0 %189 }
  0x95   :  { %v235_v38 = vadd.f32 %v219_v26, %v135_v33 }
  0x97   :  { %v267_v2 = vpop.permute.xlu1 %266 }
  0x98   :  { %675 = vperm.xlu1 %910, %v657_v1   ;;  %v1182_v3 = vpop.permute.xlu0 %197 }
  0x9b   :  { %v71_v5 = vpop.permute.xlu1 %70 }
  0x9c   :  { %685 = vperm.xlu1 %910, %v659_v4   ;;  %v1187_v6 = vpop.permute.xlu0 %205  ;;  %v136_v49 = vmul.f32 %v1203_v12, %v71_v5  ;;  %v669_v5 = vld [vmem:[%s1311_s5 + $0x60] sm:$0xff] }
  0x9e   :  { %v236_v54 = vadd.f32 %v220_v48, %v136_v49 }
  0x9f   :  { %v76_v8 = vpop.permute.xlu1 %75 }
  0xa0   :  { %690 = vperm.xlu1 %910, %v660_v7   ;;  %v137_v50 = vmul.f32 %v1203_v12, %v76_v8 }
  0xa1   :  { %v51_v9 = vpop.permute.xlu0 %50 }
  0xa2   :  { %v132_v13 = vmul.f32 %v1203_v12, %v51_v9  ;;  %v670_v9 = vld [vmem:[%s1311_s5 + $0x68] sm:$0xff] }
  0xa4   :  { %695 = vperm.xlu1 %910, %v661_v10   ;;  %v170_v14 = vpop.permute.xlu1 %169  ;;  %v232_v19 = vadd.f32 %v216_v17, %v132_v13  ;;  %v222_v13 = vmul.f32 %v1198_v11, %v1161_v56 }
  0xa5   :  { %v56_v15 = vpop.permute.xlu0 %55  ;;  %v221_v44 = vmul.f32 %v1198_v11, %v170_v14 }
  0xa6   :  { %v133_v20 = vmul.f32 %v1203_v12, %v56_v15  ;;  %v344_v27 = vadd.f32 %v267_v2, %v232_v19 }
  0xa7   :  { %v237_v55 = vadd.f32 %v221_v44, %v137_v50 }
  0xa8   :  { %700 = vperm.xlu1 %910, %v662_v16   ;;  %v233_v29 = vadd.f32 %v217_v24, %v133_v20  ;;  %v360_v36 = vmax.f32 %v344_v27, 0.0 }
  0xa9   :  { %v61_v21 = vpop.permute.xlu0 %60  ;;  %v277_v22 = vpop.permute.xlu1 %276 }
  0xaa   :  { %v134_v25 = vmul.f32 %v1203_v12, %v61_v21 }
  0xac   :  { %v234_v28 = vadd.f32 %v218_v18, %v134_v25  ;;  %705 = vperm.xlu1 %910, %v663_v23   ;;  %v672_v18 = vld [vmem:[%s1311_s5 + $0x78] sm:$0xff] }
  0xad   :  { %v272_v30 = vpop.permute.xlu0 %271  ;;  %v81_v31 = vpop.permute.xlu1 %80 }
  0xae   :  { %v345_v34 = vadd.f32 %v272_v30, %v233_v29  ;;  %v346_v35 = vadd.f32 %v277_v22, %v234_v28  ;;  %v138_v14 = vmul.f32 %v1203_v12, %v81_v31  ;;  %v224_v29 = vmul.f32 %v1198_v11, %v1166_v59 }
  0xb0   :  { %v361_v37 = vmax.f32 %v345_v34, 0.0  ;;  %710 = vperm.xlu1 %910, %v664_v32   ;;  %v362_v45 = vmax.f32 %v346_v35, 0.0  ;;  %v238_v20 = vadd.f32 %v222_v13, %v138_v14 }
  0xb1   :  { %v282_v39 = vpop.permute.xlu0 %281  ;;  %v86_v40 = vpop.permute.xlu1 %85 }
  0xb2   :  { %v392_v42 = vpack.c.bf16 %v361_v37, %v360_v36  ;;  %v347_v43 = vadd.f32 %v282_v39, %v235_v38  ;;  %v139_v10 = vmul.f32 %v1203_v12, %v86_v40 }
  0xb4   :  { %v363_v46 = vmax.f32 %v347_v43, 0.0  ;;  %715 = vperm.xlu1 %910, %v665_v41   ;;  %842 = vmatprep.subr.bf16.mxu0 %v392_v42 }
  0xb5   :  { %874 = vmatprep.subr.bf16.mxu1 %v392_v42  ;;  %843 = vmatpush3.bf16.msra.mxu0 %v392_v42  ;;  %v292_v53 = vpop.permute.xlu0 %291 }
  0xb6   :  { %v393_v51 = vpack.c.bf16 %v363_v46, %v362_v45  ;;  %882 = vmatpush3.bf16.msra.mxu1 %v392_v42  ;;  %v178_v52 = vpop.permute.xlu1 %177  ;;  %v349_v58 = vadd.f32 %v292_v53, %v237_v55 }
  0xb7   :  { %v223_v8 = vmul.f32 %v1198_v11, %v178_v52 }
  0xb8   :  { %720 = vperm.xlu1 %910, %v666_v47   ;;  %844 = vmatprep.subr.bf16.mxu0 %v393_v51  ;;  %v365_v63 = vmax.f32 %v349_v58, 0.0  ;;  %v226_v47 = vmul.f32 %v1198_v11, %v1177_v0 }
  0xb9   :  { %875 = vmatprep.subr.bf16.mxu1 %v393_v51  ;;  %845 = vmatpush3.bf16.msra.mxu0 %v393_v51  ;;  %v239_v15 = vadd.f32 %v223_v8, %v139_v10  ;;  %v302_v17 = vpop.permute.xlu0 %301  ;;  %v230_v10 = vmul.f32 %v1198_v11, %v1187_v6 }
  0xba   :  { %883 = vmatpush3.bf16.msra.mxu1 %v393_v51 }
  0xbb   :  { %v287_v60 = vpop.permute.xlu1 %286  ;;  %v351_v19 = vadd.f32 %v302_v17, %v239_v15 }
  0xbc   :  { %v348_v61 = vadd.f32 %v287_v60, %v236_v54  ;;  %725 = vperm.xlu1 %910, %v667_v57  }
  0xbd   :  { %v367_v23 = vmax.f32 %v351_v19, 0.0  ;;  %v312_v33 = vpop.permute.xlu0 %311 }
  0xbe   :  { %v364_v1 = vmax.f32 %v348_v61, 0.0 }
  0xbf   :  { %v91_v2 = vpop.permute.xlu1 %90 }
  0xc0   :  { %v394_v4 = vpack.c.bf16 %v365_v63, %v364_v1  ;;  %730 = vperm.xlu1 %910, %v668_v62   ;;  %v140_v30 = vmul.f32 %v1203_v12, %v91_v2  ;;  %v228_v1 = vmul.f32 %v1198_v11, %v1182_v3 }
  0xc1   :  { %v322_v48 = vpop.permute.xlu0 %321 }
  0xc2   :  { %846 = vmatprep.subr.bf16.mxu0 %v394_v4  ;;  %876 = vmatprep.subr.bf16.mxu1 %v394_v4  ;;  %v240_v35 = vadd.f32 %v224_v29, %v140_v30 }
  0xc3   :  { %v96_v7 = vpop.permute.xlu1 %95  ;;  %847 = vmatpush3.bf16.msra.mxu0 %v394_v4  ;;  %884 = vmatpush3.bf16.msra.mxu1 %v394_v4 }
  0xc4   :  { %735 = vperm.xlu1 %910, %v669_v5   ;;  %v141_v28 = vmul.f32 %v1203_v12, %v96_v7 }
  0xc5   :  { %v332_v2 = vpop.permute.xlu0 %331 }
  0xc8   :  { %740 = vperm.xlu1 %910, %v670_v9   ;;  %v186_v16 = vpop.permute.xlu1 %185 }
  0xc9   :  { %v225_v27 = vmul.f32 %v1198_v11, %v186_v16 }
  0xcb   :  { %v241_v31 = vadd.f32 %v225_v27, %v141_v28  ;;  %v918_v27 = vld [vmem:[%s1309_s3 + $0x38] sm:$0xff]   ;;  %v419_v28 = vpop.permute.xlu0 %418 }
  0xcc   :  { %750 = vperm.xlu1 %910, %v672_v18  }
  0xcd   :  { %v297_v21 = vpop.permute.xlu1 %296  ;;  %v353_v34 = vadd.f32 %v312_v33, %v241_v31 }
  0xce   :  { %v350_v22 = vadd.f32 %v297_v21, %v238_v20 }
  0xcf   :  { %v369_v39 = vmax.f32 %v353_v34, 0.0  ;;  %v429_v30 = vpop.permute.xlu0 %428 }
  0xd0   :  { %v366_v24 = vmax.f32 %v350_v22, 0.0 }
  0xd1   :  { %v101_v25 = vpop.permute.xlu1 %100 }
  0xd2   :  { %v395_v26 = vpack.c.bf16 %v367_v23, %v366_v24  ;;  %v142_v44 = vmul.f32 %v1203_v12, %v101_v25  ;;  %v915_v25 = vld [vmem:[%s1309_s3 + $0x10] sm:$0xff]  }
  0xd4   :  { %848 = vmatprep.subr.bf16.mxu0 %v395_v26  ;;  %877 = vmatprep.subr.bf16.mxu1 %v395_v26  ;;  %v242_v50 = vadd.f32 %v226_v47, %v142_v44 }
  0xd5   :  { %v106_v56 = vpop.permute.xlu1 %105  ;;  %849 = vmatpush3.bf16.msra.mxu0 %v395_v26  ;;  %885 = vmatpush3.bf16.msra.mxu1 %v395_v26  ;;  %v916_v26 = vld [vmem:[%s1309_s3 + $0x30] sm:$0xff]  }
  0xd6   :  { %v143_v43 = vmul.f32 %v1203_v12, %v106_v56  ;;  %v917_v56 = vld [vmem:[%s1309_s3 + $0x18] sm:$0xff]  }
  0xda   :  { %v194_v32 = vpop.permute.xlu1 %193 }
  0xdb   :  { %v227_v59 = vmul.f32 %v1198_v11, %v194_v32  ;;  %v439_v32 = vpop.permute.xlu0 %438 }
  0xdd   :  { %v243_v45 = vadd.f32 %v227_v59, %v143_v43 }
  0xdf   :  { %v307_v36 = vpop.permute.xlu1 %306  ;;  %v355_v49 = vadd.f32 %v322_v48, %v243_v45  ;;  %v681_v34 = vpop.permute.xlu0 %680 }
  0xe0   :  { %v352_v37 = vadd.f32 %v307_v36, %v240_v35 }
  0xe1   :  { %v371_v55 = vmax.f32 %v355_v49, 0.0 }
  0xe2   :  { %v368_v38 = vmax.f32 %v352_v37, 0.0 }
  0xe3   :  { %v111_v40 = vpop.permute.xlu1 %110  ;;  %v444_v36 = vpop.permute.xlu0 %443 }
  0xe4   :  { %v396_v41 = vpack.c.bf16 %v369_v39, %v368_v38  ;;  %v144_v0 = vmul.f32 %v1203_v12, %v111_v40 }
  0xe6   :  { %850 = vmatprep.subr.bf16.mxu0 %v396_v41  ;;  %878 = vmatprep.subr.bf16.mxu1 %v396_v41  ;;  %v244_v5 = vadd.f32 %v228_v1, %v144_v0 }
  0xe7   :  { %v116_v42 = vpop.permute.xlu1 %115  ;;  %851 = vmatpush3.bf16.msra.mxu0 %v396_v41  ;;  %886 = vmatpush3.bf16.msra.mxu1 %v396_v41  ;;  %v449_v38 = vpop.permute.xlu0 %448 }
  0xe8   :  { %v145_v61 = vmul.f32 %v1203_v12, %v116_v42 }
  0xeb   :  { %v454_v40 = vpop.permute.xlu0 %453 }
  0xec   :  { %v202_v46 = vpop.permute.xlu1 %201 }
  0xed   :  { %v229_v60 = vmul.f32 %v1198_v11, %v202_v46 }
  0xef   :  { %v245_v62 = vadd.f32 %v229_v60, %v145_v61  ;;  %v459_v42 = vpop.permute.xlu0 %458 }
  0xf1   :  { %v317_v51 = vpop.permute.xlu1 %316  ;;  %v357_v4 = vadd.f32 %v332_v2, %v245_v62 }
  0xf2   :  { %v354_v52 = vadd.f32 %v317_v51, %v242_v50 }
  0xf3   :  { %v373_v15 = vmax.f32 %v357_v4, 0.0  ;;  %v464_v43 = vpop.permute.xlu0 %463 }
  0xf4   :  { %v370_v53 = vmax.f32 %v354_v52, 0.0 }
  0xf5   :  { %v121_v57 = vpop.permute.xlu1 %120 }
  0xf6   :  { %v397_v58 = vpack.c.bf16 %v371_v55, %v370_v53  ;;  %v146_v8 = vmul.f32 %v1203_v12, %v121_v57 }
  0xf7   :  { %v469_v45 = vpop.permute.xlu0 %468 }
  0xf8   :  { %852 = vmatprep.subr.bf16.mxu0 %v397_v58  ;;  %879 = vmatprep.subr.bf16.mxu1 %v397_v58  ;;  %v246_v19 = vadd.f32 %v230_v10, %v146_v8 }
  0xf9   :  { %v126_v54 = vpop.permute.xlu1 %125  ;;  %853 = vmatpush3.bf16.msra.mxu0 %v397_v58  ;;  %887 = vmatpush3.bf16.msra.mxu1 %v397_v58 }
  0xfa   :  { %v147_v17 = vmul.f32 %v1203_v12, %v126_v54  ;;  %v914_v12 = vld [vmem:[%s1309_s3 + $0x28] sm:$0xff]  }
  0xfb   :  { %v474_v47 = vpop.permute.xlu0 %473 }
  0xfe   :  { %v210_v63 = vpop.permute.xlu1 %209 }
  0xff   :  { %v231_v13 = vmul.f32 %v1198_v11, %v210_v63  ;;  %v913_v11 = vld [vmem:[%s1309_s3 + $0x8] sm:$0xff]   ;;  %v479_v2 = vpop.permute.xlu0 %478  ;;  %s945_s3 = smov [#allocation3]  }
 0x100   :  { %s808_s20 = sshll.u32 %s945_s3, 4  ;;  %s809_s20 = int_to_ptr.vmem [resolvable:$true] %s808_s20 }
 0x101   :  { %v247_v20 = vadd.f32 %v231_v13, %v147_v17  ;;  %s919_s21 = scalar_lea.vmem %s809_s20, 16  ;;  %s923_s22 = scalar_lea.vmem %s809_s20, 32 }
 0x102   :  { %p920_p0 = scmp.ne.s32.totalorder %s809_s20, %s919_s21  ;;  %p924_p1 = scmp.lt.s32.totalorder %s809_s20, %s809_s20 }
 0x103   :  { %v327_v7 = vpop.permute.xlu1 %326  ;;  %p925_p2 = scmp.lt.s32.totalorder %s923_s22, %s919_s21 }
 0x104   :  { %v356_v9 = vadd.f32 %v327_v7, %v244_v5 }
 0x105   :  { %p926_p3 = por %p925_p2, %p924_p1 }
 0x106   :  { %v372_v14 = vmax.f32 %v356_v9, 0.0 }
 0x107   :  { %v337_v16 = vpop.permute.xlu1 %336  ;;  %p927_p4 = pnand %p926_p3, %p920_p0 }
 0x108   :  { %v398_v18 = vpack.c.bf16 %v373_v15, %v372_v14  ;;  %v358_v3 = vadd.f32 %v337_v16, %v246_v19 }
 0x10a   :  { %854 = vmatprep.subr.bf16.mxu0 %v398_v18  ;;  %880 = vmatprep.subr.bf16.mxu1 %v398_v18  ;;  %v374_v23 = vmax.f32 %v358_v3, 0.0 }
 0x10b   :  { %v342_v21 = vpop.permute.xlu1 %341  ;;  %855 = vmatpush3.bf16.msra.mxu0 %v398_v18  ;;  %888 = vmatpush3.bf16.msra.mxu1 %v398_v18 }
 0x10c   :  { %v359_v22 = vadd.f32 %v342_v21, %v247_v20 }
 0x10e   :  { %v375_v24 = vmax.f32 %v359_v22, 0.0 }
 0x10f   :  { %v424_v29 = vpop.permute.xlu1 %423 }
 0x110   :  { %v399_v6 = vpack.c.bf16 %v375_v24, %v374_v23 }
 0x112   :  { %856 = vmatprep.subr.bf16.mxu0 %v399_v6  ;;  %881 = vmatprep.subr.bf16.mxu1 %v399_v6 }
 0x113   :  { %857 = vmatpush3.bf16.msra.mxu0 %v399_v6  ;;  %889 = vmatpush3.bf16.msra.mxu1 %v399_v6  ;;  %v434_v31 = vpop.permute.xlu1 %433 }
 0x116   :  { %859 = vmatmul.mubr.bf16.vlgmr.msra.gmra.mrb[0].mxu0 %v913_v11  ;;  %867 = vmatmul.mubr.bf16.vlgmr.msra.gmra.mrb[0].mxu1 %v914_v12 }
 0x117   :  { %862 = vmatprep.mubr.bf16.mxu0 %v915_v25  ;;  %870 = vmatprep.mubr.bf16.mxu1 %v916_v26  ;;  %v676_v33 = vpop.permute.xlu1 %675 }
 0x11b   :  { %v686_v35 = vpop.permute.xlu1 %685 }
 0x11e   :  { %863 = vmatmul.mubr.bf16.gmra.mrb[4].mxu0 %v917_v56  ;;  %871 = vmatmul.mubr.bf16.gmra.mrb[4].mxu1 %v918_v27 }
 0x11f   :  { %v691_v37 = vpop.permute.xlu1 %690 }
 0x123   :  { %v696_v39 = vpop.permute.xlu1 %695 }
 0x127   :  { %v701_v41 = vpop.permute.xlu1 %700 }
 0x12b   :  { %v706_v59 = vpop.permute.xlu1 %705 }
 0x12f   :  { %v711_v44 = vpop.permute.xlu1 %710 }
 0x133   :  { %v716_v46 = vpop.permute.xlu1 %715 }
 0x137   :  { %v1291_v48 = vpop.permute.xlu1 %720 }
 0x13b   :  { %v726_v4 = vpop.permute.xlu1 %725 }
 0x1e9   :  { %v860_v49 = vpop.f32.mrb[0].mxu0  ;;  %v868_v50 = vpop.f32.mrb[0].mxu1 }
 0x1ea   :  { %v578_v51 = vpop.f32.mrb[1].mxu0  ;;  %v610_v52 = vpop.f32.mrb[1].mxu1  ;;  %v587_v53 = vadd.f32 %v860_v49, %v429_v30 }
 0x1eb   :  { %v579_v55 = vadd.f32 %v578_v51, %v419_v28  ;;  %v861_v57 = vpop.f32.mrb[2].mxu0  ;;  %v869_v58 = vpop.f32.mrb[2].mxu1  ;;  %v611_v12 = vadd.f32 %v610_v52, %v459_v42 }
 0x1ec   :  { %v590_v54 = vadd.f32 %v861_v57, %v434_v31  ;;  %v581_v60 = vpop.f32.mrb[3].mxu0  ;;  %v613_v61 = vpop.f32.mrb[3].mxu1  ;;  %v643_v63 = vmax.f32 %v587_v53, 0.0  ;;  %v622_v49 = vadd.f32 %v869_v58, %v474_v47 }
 0x1ed   :  { %v641_v0 = vmax.f32 %v579_v55, 0.0  ;;  %v582_v62 = vadd.f32 %v581_v60, %v424_v29  ;;  %v484_v28 = vpop.permute.xlu0 %483  ;;  %v614_v29 = vadd.f32 %v613_v61, %v464_v43 }
 0x1ee   :  { %v644_v5 = vmax.f32 %v590_v54, 0.0  ;;  %v755_v15 = vmul.f32 %v686_v35, %v643_v63  ;;  %v649_v35 = vmax.f32 %v611_v12, 0.0  ;;  %v652_v54 = vmax.f32 %v622_v49, 0.0 }
 0x1ef   :  { %v642_v1 = vmax.f32 %v582_v62, 0.0  ;;  %v753_v7 = vmul.f32 %v676_v33, %v641_v0  ;;  %v650_v51 = vmax.f32 %v614_v29, 0.0 }
 0x1f0   :  { %v756_v20 = vmul.f32 %v691_v37, %v644_v5  ;;  %v761_v52 = vmul.f32 %v716_v46, %v649_v35 }
 0x1f1   :  { %v754_v8 = vmul.f32 %v681_v34, %v642_v1  ;;  %v864_v9 = vpop.f32.mrb[4].mxu0  ;;  %v872_v10 = vpop.f32.mrb[4].mxu1  ;;  %v619_v34 = vadd.f32 %v868_v50, %v469_v45  ;;  %v762_v43 = vmul.f32 %v1291_v48, %v650_v51 }
 0x1f2   :  { %v594_v13 = vpop.f32.mrb[5].mxu0  ;;  %v626_v14 = vpop.f32.mrb[5].mxu1  ;;  %v603_v17 = vadd.f32 %v864_v9, %v449_v38 }
 0x1f3   :  { %v769_v16 = vadd.f32 %v754_v8, %v753_v7  ;;  %v595_v18 = vadd.f32 %v594_v13, %v439_v32  ;;  %v865_v19 = vpop.f32.mrb[6].mxu0  ;;  %v873_v3 = vpop.f32.mrb[6].mxu1  ;;  %v651_v42 = vmax.f32 %v619_v34, 0.0 }
 0x1f4   :  { %v597_v21 = vpop.f32.mrb[7].mxu0  ;;  %v629_v22 = vpop.f32.mrb[7].mxu1  ;;  %v606_v6 = vadd.f32 %v865_v19, %v454_v40  ;;  %v647_v25 = vmax.f32 %v603_v17, 0.0 }
 0x1f5   :  { %v770_v23 = vadd.f32 %v769_v16, %v755_v15  ;;  %v645_v24 = vmax.f32 %v595_v18, 0.0  ;;  %v598_v11 = vadd.f32 %v597_v21, %v444_v36  ;;  %v731_v32 = vpop.permute.xlu1 %730  ;;  %v489_v36 = vpop.permute.xlu0 %488  ;;  %v763_v61 = vmul.f32 %v726_v4, %v651_v42 }
 0x1f6   :  { %v648_v31 = vmax.f32 %v606_v6, 0.0  ;;  %v759_v37 = vmul.f32 %v706_v59, %v647_v25  ;;  %v635_v45 = vadd.f32 %v872_v10, %v489_v36  ;;  %v764_v47 = vmul.f32 %v731_v32, %v652_v54 }
 0x1f7   :  { %v757_v26 = vmul.f32 %v696_v39, %v645_v24  ;;  %v771_v56 = vadd.f32 %v770_v23, %v756_v20  ;;  %v646_v27 = vmax.f32 %v598_v11, 0.0  ;;  %v627_v39 = vadd.f32 %v626_v14, %v479_v2 }
 0x1f8   :  { %v760_v53 = vmul.f32 %v711_v44, %v648_v31  ;;  %v655_v1 = vmax.f32 %v635_v45, 0.0  ;;  %v796_v15 = vlaneseq }
 0x1f9   :  { %v772_v30 = vadd.f32 %v771_v56, %v757_v26  ;;  %v758_v33 = vmul.f32 %v701_v41, %v646_v27  ;;  %v736_v57 = vpop.permute.xlu1 %735  ;;  %v630_v41 = vadd.f32 %v629_v22, %v484_v28  ;;  %v653_v50 = vmax.f32 %v627_v39, 0.0  ;;  %v494_v0 = vpop.permute.xlu0 %493 }
 0x1fa   :  { %v638_v58 = vadd.f32 %v873_v3, %v494_v0  ;;  %v797_v18 = vshrl.u32 %v796_v15, 7 }
 0x1fb   :  { %v773_v38 = vadd.f32 %v772_v30, %v758_v33  ;;  %v654_v44 = vmax.f32 %v630_v41, 0.0  ;;  %v765_v46 = vmul.f32 %v736_v57, %v653_v50 }
 0x1fc   :  { %v656_v5 = vmax.f32 %v638_v58, 0.0  ;;  %v798_v20 = vsub.s32 0, %v797_v18 }
 0x1fd   :  { %v774_v40 = vadd.f32 %v773_v38, %v759_v37  ;;  %v741_v63 = vpop.permute.xlu1 %740  ;;  %v746_v9 = vpop.permute.xlu0 %745 }
 0x1fe   :  { %v766_v7 = vmul.f32 %v741_v63, %v654_v44  ;;  %v767_v48 = vmul.f32 %v746_v9, %v655_v1 }
 0x1ff   :  { %v775_v55 = vadd.f32 %v774_v40, %v760_v53 }
 0x201   :  { %v776_v60 = vadd.f32 %v775_v55, %v761_v52  ;;  %v751_v14 = vpop.permute.xlu1 %750  ;;  %v794_v22 = vpop.permute.xlu0 %793 }
 0x202   :  { %v768_v4 = vmul.f32 %v751_v14, %v656_v5  ;;  %v799_v24 = vrot.slane %v794_v22, %v798_v20 }
 0x203   :  { %v777_v59 = vadd.f32 %v776_v60, %v762_v43 }
 0x205   :  { %v778_v62 = vadd.f32 %v777_v59, %v763_v61 }
 0x207   :  { %v779_v2 = vadd.f32 %v778_v62, %v764_v47 }
 0x209   :  { %v780_v8 = vadd.f32 %v779_v2, %v765_v46 }
 0x20b   :  { %v781_v13 = vadd.f32 %v780_v8, %v766_v7 }
 0x20d   :  { %v782_v10 = vadd.f32 %v781_v13, %v767_v48 }
 0x20f   :  { %v783_v16 = vadd.f32 %v782_v10, %v768_v4 }
 0x211   :  { %v784_v17 = vrot.slane %v783_v16, 4 }
 0x213   :  { %v785_v19 = vadd.f32 %v784_v17, %v783_v16 }
 0x215   :  { %v786_v3 = vrot.slane %v785_v19, 2 }
 0x217   :  { %v787_v21 = vadd.f32 %v786_v3, %v785_v19 }
 0x219   :  { %v788_v23 = vrot.slane %v787_v21, 1 }
 0x21b   :  { %v789_v6 = vadd.f32 %v788_v23, %v787_v21 }
 0x21d   :  { %v800_v11 = vadd.f32 %v799_v24, %v789_v6 }
 0x21f   :  { %801 = vst [vmem:[#allocation3] sm:$0x1] %v800_v11 }
 0x220   :  { %930 = shalt.err (!%p927_p4)
}
 0x221   :  { %s931_s25 = scalar_lea.hbm %s1313_s7, 16 }
 0x222   :  { %p932_p5 = scmp.ne.s32.totalorder %s1313_s7, %s931_s25  ;;  %p935_p6 = scmp.lt.u32.totalorder %s931_s25, %s1313_s7 }
 0x224   :  { %p937_p7 = pnand %p935_p6, %p932_p5 }
 0x226   :  { %940 = shalt.err (!%p937_p7)
}
 0x227   :  { %811 = dma.vmem_to_hbm [thread:$0]  %s809_s20, 16, %s1313_s7, [#allocation4]  }
 0x228   :  { %941 = dma.done.wait [#allocation4], 16  }
 0x229   :  { %942 = vsyncadd [#allocation4], 4294967280 }
 0x22a   :  { %815 = vsyncpa [#allocation4], 1 }

</bundles_post_ra>
